<compile_context>
chip_gen: v7x
topology: tpu7x:2x2x1
jax: 0.10.0
libtpu: 0.0.40
codegen_flags: <defaults>
</compile_context>

<pallas_src>
import jax
import jax.numpy as jnp
from jax.experimental import pallas as pl
from jax.experimental.pallas import tpu as pltpu


def _round_up(x, m):
    return (x + m - 1) // m * m


def critic_kernel(x_ref, w1_ref, b1_ref, w2_ref, b2_ref, w3_ref, b3_ref, o_ref):
    # Feature-major: activations are (features, batch_tile); lane axis = batch.
    # layer1 + ReLU  (MXU matmul, f32 accumulation; f32 epilogue)
    h1 = jnp.dot(w1_ref[...], x_ref[...], preferred_element_type=jnp.float32)
    h1 = jnp.maximum(h1 + b1_ref[...], 0.0)
    # layer2 + ReLU
    h2 = jnp.dot(w2_ref[...], h1.astype(w2_ref.dtype),
                 preferred_element_type=jnp.float32)
    h2 = jnp.maximum(h2 + b2_ref[...], 0.0)
    # layer3 (value head): (out_dim,128)@(128,tb) -> lane-dense (out_dim, tb)
    out = jnp.dot(w3_ref[...], h2.astype(w3_ref.dtype),
                  preferred_element_type=jnp.float32)
    o_ref[...] = (out + b3_ref[...]).astype(o_ref.dtype)


def prepare_params(w1, b1, w2, b2, w3, b3, compute_dtype=jnp.bfloat16):
    """One-time conversion to the kernel layout (hoisted out of the hot path).

    Weights are torch-style (fan_out, fan_in) and are cast to the MXU compute
    dtype once; biases become (fan_out, 1) f32 columns (lane-broadcast in-kernel).
    """
    return (w1.astype(compute_dtype), b1.reshape(-1, 1).astype(jnp.float32),
            w2.astype(compute_dtype), b2.reshape(-1, 1).astype(jnp.float32),
            w3.astype(compute_dtype), b3.reshape(-1, 1).astype(jnp.float32))


def feedforward_critic(obs, params, *, block_b=1024):
    """obs: (B, in_dim) f32, params from prepare_params() -> (B, out_dim) f32."""
    w1, b1, w2, b2, w3, b3 = params
    B, in_dim = obs.shape
    out_dim = w3.shape[0]
    compute_dtype = w1.dtype

    # Batch is the lane axis: tile is a multiple of 128, big enough to amortize
    # per-step overhead; keep >=2 grid steps when the batch can be split so
    # v7x's two TensorCores both pick up work (no-op on single-TC v5e/v6e).
    b_min = _round_up(B, 128)
    tb = min(_round_up(block_b, 128), b_min)
    if tb == b_min and b_min > 128:
        tb = _round_up((b_min + 1) // 2, 128)
    b_pad = _round_up(B, tb)

    # Feature-major obs: (in_dim, B_pad), cast once to the MXU dtype.
    x = obs.T
    if b_pad != B:
        x = jnp.pad(x, ((0, 0), (0, b_pad - B)))
    x = x.astype(compute_dtype)

    const = lambda shape: pl.BlockSpec(shape, lambda i: (0,) * len(shape))

    out_t = pl.pallas_call(
        critic_kernel,
        out_shape=jax.ShapeDtypeStruct((out_dim, b_pad), jnp.float32),
        grid=(b_pad // tb,),
        in_specs=[
            pl.BlockSpec((in_dim, tb), lambda i: (0, i)),   # pipelined obs tile
            const(w1.shape), const(b1.shape),               # resident params
            const(w2.shape), const(b2.shape),
            const(w3.shape), const(b3.shape),
        ],
        out_specs=pl.BlockSpec((out_dim, tb), lambda i: (0, i)),  # lane-dense
        compiler_params=pltpu.CompilerParams(
            dimension_semantics=("parallel",)),
    )(x, w1, b1, w2, b2, w3, b3)

    return out_t[:, :B].T  # back to (B, out_dim)


def init_params(key, in_dim, out_dim, hidden=128):
    """torch.nn.Linear-style init: W (fan_out, fan_in), b (fan_out,), U(-1/sqrt(fan_in), +)."""
    ks = jax.random.split(key, 6)

    def lin(kw, kb, fan_in, fan_out):
        bound = 1.0 / jnp.sqrt(fan_in)
        w = jax.random.uniform(kw, (fan_out, fan_in), jnp.float32, -bound, bound)
        b = jax.random.uniform(kb, (fan_out,), jnp.float32, -bound, bound)
        return w, b

    w1, b1 = lin(ks[0], ks[1], in_dim, hidden)
    w2, b2 = lin(ks[2], ks[3], hidden, hidden)
    w3, b3 = lin(ks[4], ks[5], hidden, out_dim)
    return w1, b1, w2, b2, w3, b3


def _matched_bf16_reference(obs, raw):
    """Same math as the kernel (bf16 matmul inputs, f32 accumulation), plain jnp."""
    w1, b1, w2, b2, w3, b3 = raw
    cd = jnp.bfloat16
    x = obs.T.astype(cd)
    h = jnp.maximum(jnp.dot(w1.astype(cd), x,
                            preferred_element_type=jnp.float32) + b1[:, None], 0.0)
    h = jnp.maximum(jnp.dot(w2.astype(cd), h.astype(cd),
                            preferred_element_type=jnp.float32) + b2[:, None], 0.0)
    out = jnp.dot(w3.astype(cd), h.astype(cd),
                  preferred_element_type=jnp.float32) + b3[:, None]
    return out.T


def _torch_reference_f32(obs, raw):
    w1, b1, w2, b2, w3, b3 = raw
    h = jnp.maximum(obs @ w1.T + b1, 0.0)
    h = jnp.maximum(h @ w2.T + b2, 0.0)
    return h @ w3.T + b3


if __name__ == "__main__":
    key = jax.random.PRNGKey(0)
    k_obs, k_params = jax.random.split(key)

    in_dim, out_dim, hidden = 32, 1, 128
    raw = init_params(k_params, in_dim, out_dim, hidden)
    params = prepare_params(*raw)   # one-time cast/reshape, not per call

    # batch=40  -> single grid step + batch padding (128-lane tile)
    # batch=300 -> padded to 512, tile 256, 2 "parallel" grid steps (v7x split)
    for batch in (40, 300):
        obs = jax.random.normal(k_obs, (batch, in_dim), jnp.float32)

        out = feedforward_critic(obs, params)
        out = jax.block_until_ready(out)
        assert out.shape == (batch, out_dim)

        # Matched-precision reference (bf16 matmul inputs, f32 accumulation).
        ref = _matched_bf16_reference(obs, raw)
        assert jnp.allclose(out, ref, atol=2e-3, rtol=2e-3), \
            float(jnp.max(jnp.abs(out - ref)))

        # Loose check against the exact f32 PyTorch-equivalent forward.
        ref32 = _torch_reference_f32(obs, raw)
        assert jnp.allclose(out, ref32, atol=5e-2, rtol=5e-2)

    print("KERNEL_OK")
</pallas_src>

<mosaic_0001>
module attributes {stable_mosaic.version = 11 : i64} {
  func.func @critic_kernel(%arg0: i32, %arg1: memref<32x128xbf16, #tpu.memory_space<vmem>>, %arg2: memref<128x32xbf16, #tpu.memory_space<vmem>>, %arg3: memref<128x1xf32, #tpu.memory_space<vmem>>, %arg4: memref<128x128xbf16, #tpu.memory_space<vmem>>, %arg5: memref<128x1xf32, #tpu.memory_space<vmem>>, %arg6: memref<1x128xbf16, #tpu.memory_space<vmem>>, %arg7: memref<1x1xf32, #tpu.memory_space<vmem>>, %arg8: memref<1x128xf32, #tpu.memory_space<vmem>>) attributes {dimension_semantics = [#tpu.dimension_semantics<parallel>], iteration_bounds = array<i64: 1>, scalar_prefetch = 0 : i64, scratch_operands = 0 : i64, tpu.core_type = #tpu.core_type<tc>, window_params = [{transform_indices = @transform_0, window_bounds = array<i64: 32, 128>}, {pipeline_mode = #tpu.pipeline_mode<synchronous>, transform_indices = @transform_1, window_bounds = array<i64: 128, 32>}, {pipeline_mode = #tpu.pipeline_mode<synchronous>, transform_indices = @transform_2, window_bounds = array<i64: 128, 1>}, {pipeline_mode = #tpu.pipeline_mode<synchronous>, transform_indices = @transform_3, window_bounds = array<i64: 128, 128>}, {pipeline_mode = #tpu.pipeline_mode<synchronous>, transform_indices = @transform_4, window_bounds = array<i64: 128, 1>}, {pipeline_mode = #tpu.pipeline_mode<synchronous>, transform_indices = @transform_5, window_bounds = array<i64: 1, 128>}, {pipeline_mode = #tpu.pipeline_mode<synchronous>, transform_indices = @transform_6, window_bounds = array<i64: 1, 1>}, {transform_indices = @transform_7, window_bounds = array<i64: 1, 128>}]} {
    %c0 = arith.constant 0 : index
    %c0_0 = arith.constant 0 : index
    %0 = vector.load %arg2[%c0, %c0_0] : memref<128x32xbf16, #tpu.memory_space<vmem>>, vector<128x32xbf16>
    %c0_1 = arith.constant 0 : index
    %c0_2 = arith.constant 0 : index
    %1 = vector.load %arg1[%c0_1, %c0_2] : memref<32x128xbf16, #tpu.memory_space<vmem>>, vector<32x128xbf16>
    %cst = arith.constant dense<0.000000e+00> : vector<128x128xf32>
    %2 = tpu.matmul %0, %1, %cst {dimension_numbers = #tpu.dot_dimension_numbers<[1], [0], [0], [1], [0, 0, 1, 1], [], []>} : vector<128x32xbf16>, vector<32x128xbf16>, vector<128x128xf32> -> vector<128x128xf32>
    %c0_3 = arith.constant 0 : index
    %c0_4 = arith.constant 0 : index
    %3 = vector.load %arg3[%c0_3, %c0_4] : memref<128x1xf32, #tpu.memory_space<vmem>>, vector<128x1xf32>
    %4 = vector.broadcast %3 : vector<128x1xf32> to vector<128x128xf32>
    %5 = arith.addf %2, %4 : vector<128x128xf32>
    %cst_5 = arith.constant 0.000000e+00 : f32
    %6 = vector.broadcast %cst_5 : f32 to vector<128x128xf32>
    %7 = arith.maximumf %5, %6 : vector<128x128xf32>
    %c0_6 = arith.constant 0 : index
    %c0_7 = arith.constant 0 : index
    %8 = vector.load %arg4[%c0_6, %c0_7] : memref<128x128xbf16, #tpu.memory_space<vmem>>, vector<128x128xbf16>
    %9 = arith.truncf %7 : vector<128x128xf32> to vector<128x128xbf16>
    %cst_8 = arith.constant dense<0.000000e+00> : vector<128x128xf32>
    %10 = tpu.matmul %8, %9, %cst_8 {dimension_numbers = #tpu.dot_dimension_numbers<[1], [0], [0], [1], [0, 0, 1, 1], [], []>} : vector<128x128xbf16>, vector<128x128xbf16>, vector<128x128xf32> -> vector<128x128xf32>
    %c0_9 = arith.constant 0 : index
    %c0_10 = arith.constant 0 : index
    %11 = vector.load %arg5[%c0_9, %c0_10] : memref<128x1xf32, #tpu.memory_space<vmem>>, vector<128x1xf32>
    %12 = vector.broadcast %11 : vector<128x1xf32> to vector<128x128xf32>
    %13 = arith.addf %10, %12 : vector<128x128xf32>
    %cst_11 = arith.constant 0.000000e+00 : f32
    %14 = vector.broadcast %cst_11 : f32 to vector<128x128xf32>
    %15 = arith.maximumf %13, %14 : vector<128x128xf32>
    %c0_12 = arith.constant 0 : index
    %c0_13 = arith.constant 0 : index
    %16 = vector.load %arg6[%c0_12, %c0_13] : memref<1x128xbf16, #tpu.memory_space<vmem>>, vector<1x128xbf16>
    %17 = arith.truncf %15 : vector<128x128xf32> to vector<128x128xbf16>
    %cst_14 = arith.constant dense<0.000000e+00> : vector<1x128xf32>
    %18 = tpu.matmul %16, %17, %cst_14 {dimension_numbers = #tpu.dot_dimension_numbers<[1], [0], [0], [1], [0, 0, 1, 1], [], []>} : vector<1x128xbf16>, vector<128x128xbf16>, vector<1x128xf32> -> vector<1x128xf32>
    %c0_15 = arith.constant 0 : index
    %c0_16 = arith.constant 0 : index
    %19 = vector.load %arg7[%c0_15, %c0_16] : memref<1x1xf32, #tpu.memory_space<vmem>>, vector<1x1xf32>
    %20 = vector.broadcast %19 : vector<1x1xf32> to vector<1x128xf32>
    %21 = arith.addf %18, %20 : vector<1x128xf32>
    %c0_17 = arith.constant 0 : index
    %c0_18 = arith.constant 0 : index
    %22 = vector.load %arg8[%c0_17, %c0_18] : memref<1x128xf32, #tpu.memory_space<vmem>>, vector<1x128xf32>
    tpu.vector_store %arg8[%c0_17, %c0_18], %21 {strides = array<i32>} : memref<1x128xf32, #tpu.memory_space<vmem>>, vector<1x128xf32>,
    return
  }
  func.func @transform_0(%arg0: i32) -> (i32, i32) {
    %c0_i32 = arith.constant 0 : i32
    %c0_i32_0 = arith.constant 0 : i32
    return %c0_i32, %arg0 : i32, i32
  }
  func.func @transform_1(%arg0: i32) -> (i32, i32) {
    %c0_i32 = arith.constant 0 : i32
    %c0_i32_0 = arith.constant 0 : i32
    %c0_i32_1 = arith.constant 0 : i32
    return %c0_i32, %c0_i32_0 : i32, i32
  }
  func.func @transform_2(%arg0: i32) -> (i32, i32) {
    %c0_i32 = arith.constant 0 : i32
    %c0_i32_0 = arith.constant 0 : i32
    %c0_i32_1 = arith.constant 0 : i32
    return %c0_i32, %c0_i32_0 : i32, i32
  }
  func.func @transform_3(%arg0: i32) -> (i32, i32) {
    %c0_i32 = arith.constant 0 : i32
    %c0_i32_0 = arith.constant 0 : i32
    %c0_i32_1 = arith.constant 0 : i32
    return %c0_i32, %c0_i32_0 : i32, i32
  }
  func.func @transform_4(%arg0: i32) -> (i32, i32) {
    %c0_i32 = arith.constant 0 : i32
    %c0_i32_0 = arith.constant 0 : i32
    %c0_i32_1 = arith.constant 0 : i32
    return %c0_i32, %c0_i32_0 : i32, i32
  }
  func.func @transform_5(%arg0: i32) -> (i32, i32) {
    %c0_i32 = arith.constant 0 : i32
    %c0_i32_0 = arith.constant 0 : i32
    %c0_i32_1 = arith.constant 0 : i32
    return %c0_i32, %c0_i32_0 : i32, i32
  }
  func.func @transform_6(%arg0: i32) -> (i32, i32) {
    %c0_i32 = arith.constant 0 : i32
    %c0_i32_0 = arith.constant 0 : i32
    %c0_i32_1 = arith.constant 0 : i32
    return %c0_i32, %c0_i32_0 : i32, i32
  }
  func.func @transform_7(%arg0: i32) -> (i32, i32) {
    %c0_i32 = arith.constant 0 : i32
    %c0_i32_0 = arith.constant 0 : i32
    return %c0_i32, %arg0 : i32, i32
  }
}

</mosaic_0001>

<bundles_post_ra>
// kernel: tpu_custom_call.1
= control target key start
LH: loop header
LB: loop body
LE: loop exit
PB: predicated region body
PF: predicated region fallthrough
CT: control target
= control target key end

     0   :  { %s1101_s0 = inlined_call_operand.vmem [shape: bf16[32,128], index: 0, kind: input, shape index: {}]   ;;  %s1102_s1 = inlined_call_operand.vmem [shape: bf16[128,32], index: 1, kind: input, shape index: {}]   ;;  %s1103_s2 = inlined_call_operand.vmem [shape: f32[128,1], index: 2, kind: input, shape index: {}]   ;;  %s1104_s3 = inlined_call_operand.vmem [shape: bf16[128,128], index: 3, kind: input, shape index: {}]   ;;  %s1105_s4 = inlined_call_operand.vmem [shape: f32[128,1], index: 4, kind: input, shape index: {}]   ;;  %s1106_s5 = inlined_call_operand.vmem [shape: bf16[1,128], index: 5, kind: input, shape index: {}]   ;;  %s1107_s6 = inlined_call_operand.<no memory space> [shape: f32[1,1], index: 6, kind: input, shape index: {}]   ;;  %s1108_s7 = inlined_call_operand.hbm [shape: f32[1,128], index: 7, kind: output, shape index: {}]  }
   0x1   :  { %v12_v0 = vstv %s1107_s6 }
   0x2   :  { %13 = vst [vmem:[#allocation2] sm:$0x1] %v12_v0 }
   0x3   :  { %v830_v1 = vld [vmem:[%s1101_s0] sm:$0xff]   ;;  %vm198_vm0 = vcmask 261120   ;;  %v831_v2 = vld [vmem:[%s1101_s0 + $0x8] sm:$0xff]   ;;  %v872_v4 = vmov 0   ;;  %v834_v6 = vld [vmem:[%s1102_s1 + $0x10] sm:$0xff]  }
   0x4   :  { %752 = vmatprep.subr.bf16.mxu0 %v830_v1  ;;  %v832_v3 = vld [vmem:[%s1102_s1] sm:$0xff]   ;;  %828 = vset.pattern.permute.xlu0 %v872_v4  ;;  %v833_v5 = vld [vmem:[%s1102_s1 + $0x8] sm:$0xff]   ;;  %v52_v9 = vld [vmem:[%s1103_s2 + $0x10] sm:$0xff] }
   0x5   :  { %753 = vmatpush3.bf16.msra.mxu0 %v830_v1  ;;  %829 = vset.pattern.permute.xlu1 %v872_v4  ;;  %v50_v7 = vld [vmem:[%s1103_s2] sm:$0xff]  ;;  %v51_v8 = vld [vmem:[%s1103_s2 + $0x8] sm:$0xff]  ;;  %v53_v10 = vld [vmem:[%s1103_s2 + $0x18] sm:$0xff] }
   0x6   :  { %754 = vmatprep.subr.bf16.mxu0 %v831_v2  ;;  %756 = vmatprep.mubr.msk.bf16.mxu0 %vm198_vm0, %v832_v3  ;;  %v835_v11 = vld [vmem:[%s1102_s1 + $0x18] sm:$0xff]   ;;  %v54_v12 = vld [vmem:[%s1103_s2 + $0x20] sm:$0xff]  ;;  %v55_v14 = vld [vmem:[%s1103_s2 + $0x28] sm:$0xff] }
   0x7   :  { %68 = vperm.xlu0 %828, %v50_v7   ;;  %78 = vperm.xlu1 %829, %v52_v9   ;;  %v836_v13 = vld [vmem:[%s1102_s1 + $0x20] sm:$0xff]   ;;  %v56_v15 = vld [vmem:[%s1103_s2 + $0x30] sm:$0xff]  ;;  %v837_v16 = vld [vmem:[%s1102_s1 + $0x28] sm:$0xff]  }
   0x8   :  { %v58_v17 = vld [vmem:[%s1103_s2 + $0x40] sm:$0xff]  ;;  %v57_v18 = vld [vmem:[%s1103_s2 + $0x38] sm:$0xff]  ;;  %v838_v19 = vld [vmem:[%s1102_s1 + $0x30] sm:$0xff]  }
   0x9   :  { %755 = vmatpush3.bf16.msra.mxu0 %v831_v2  ;;  %v59_v20 = vld [vmem:[%s1103_s2 + $0x48] sm:$0xff]  ;;  %v60_v21 = vld [vmem:[%s1103_s2 + $0x50] sm:$0xff] }
   0xb   :  { %73 = vperm.xlu0 %828, %v51_v8   ;;  %83 = vperm.xlu1 %829, %v53_v10  }
   0xc   :  { %757 = vmatmul.mubr.msk.bf16.vlgmr.msra.gmra.mrb[0].mxu0 %vm198_vm0, %v833_v5 }
   0xd   :  { %760 = vmatprep.mubr.msk.bf16.mxu0 %vm198_vm0, %v834_v6 }
   0xf   :  { %88 = vperm.xlu0 %828, %v54_v12   ;;  %93 = vperm.xlu1 %829, %v55_v14  }
  0x13   :  { %98 = vperm.xlu0 %828, %v56_v15   ;;  %103 = vperm.xlu1 %829, %v57_v18  }
  0x14   :  { %761 = vmatmul.mubr.msk.bf16.gmra.mrb[4].mxu0 %vm198_vm0, %v835_v11 }
  0x15   :  { %764 = vmatprep.mubr.msk.bf16.mxu0 %vm198_vm0, %v836_v13 }
  0x17   :  { %108 = vperm.xlu0 %828, %v58_v17  }
  0x1c   :  { %765 = vmatmul.mubr.msk.bf16.gmra.mrb[8].mxu0 %vm198_vm0, %v837_v16 }
  0x1d   :  { %14 = vsyncpa [#allocation4], 0  ;;  %768 = vmatprep.mubr.msk.bf16.mxu0 %vm198_vm0, %v838_v19  ;;  %113 = vperm.xlu1 %829, %v59_v20   ;;  %v61_v22 = vld [vmem:[%s1103_s2 + $0x58] sm:$0xff]  ;;  %v62_v24 = vld [vmem:[%s1103_s2 + $0x60] sm:$0xff]  ;;  %vm874_vm1 = vmmov 0   ;;  %s875_s22 = smov [#allocation3]  }
  0x1e   :  { %118 = vperm.xlu0 %828, %v60_v21   ;;  %v839_v23 = vld [vmem:[%s1102_s1 + $0x38] sm:$0xff]   ;;  %v63_v25 = vld [vmem:[%s1103_s2 + $0x68] sm:$0xff]  ;;  %v64_v26 = vld [vmem:[%s1103_s2 + $0x70] sm:$0xff]  ;;  %s683_s23 = sshll.u32 %s875_s22, 4  ;;  %s684_s23 = int_to_ptr.vmem [resolvable:$true] %s683_s23 }
  0x1f   :  { %v65_v27 = vld [vmem:[%s1103_s2 + $0x78] sm:$0xff]  ;;  %v360_v28 = vld [vmem:[%s1105_s4] sm:$0xff]  ;;  %v361_v29 = vld [vmem:[%s1105_s4 + $0x8] sm:$0xff]  ;;  %s848_s24 = scalar_lea.vmem %s684_s23, 16  ;;  %s852_s25 = scalar_lea.vmem %s684_s23, 32 }
  0x20   :  { %v362_v30 = vld [vmem:[%s1105_s4 + $0x10] sm:$0xff]  ;;  %v363_v31 = vld [vmem:[%s1105_s4 + $0x18] sm:$0xff]  ;;  %v364_v32 = vld [vmem:[%s1105_s4 + $0x20] sm:$0xff]  ;;  %p849_p0 = scmp.ne.s32.totalorder %s684_s23, %s848_s24  ;;  %p853_p1 = scmp.lt.s32.totalorder %s684_s23, %s684_s23 }
  0x21   :  { %123 = vperm.xlu1 %829, %v61_v22   ;;  %v365_v33 = vld [vmem:[%s1105_s4 + $0x28] sm:$0xff]  ;;  %v366_v34 = vld [vmem:[%s1105_s4 + $0x30] sm:$0xff]  ;;  %v367_v35 = vld [vmem:[%s1105_s4 + $0x38] sm:$0xff]  ;;  %p854_p2 = scmp.lt.s32.totalorder %s852_s25, %s848_s24 }
  0x22   :  { %128 = vperm.xlu0 %828, %v62_v24   ;;  %v368_v36 = vld [vmem:[%s1105_s4 + $0x40] sm:$0xff]  ;;  %v369_v37 = vld [vmem:[%s1105_s4 + $0x48] sm:$0xff]  ;;  %v370_v38 = vld [vmem:[%s1105_s4 + $0x50] sm:$0xff] }
  0x23   :  { %v371_v39 = vld [vmem:[%s1105_s4 + $0x58] sm:$0xff]  ;;  %v372_v40 = vld [vmem:[%s1105_s4 + $0x60] sm:$0xff]  ;;  %v373_v41 = vld [vmem:[%s1105_s4 + $0x68] sm:$0xff]  ;;  %p855_p3 = por %p854_p2, %p853_p1 }
  0x24   :  { %769 = vmatmul.mubr.msk.bf16.gmra.mrb[12].mxu0 %vm198_vm0, %v839_v23  ;;  %v374_v42 = vld [vmem:[%s1105_s4 + $0x70] sm:$0xff]  ;;  %v375_v43 = vld [vmem:[%s1105_s4 + $0x78] sm:$0xff]  ;;  %v626_v44 = vld [vmem:[#allocation2] sm:$0x1] }
  0x25   :  { %133 = vperm.xlu1 %829, %v63_v25   ;;  %v840_v45 = vld [vmem:[%s1104_s3] sm:$0xff]   ;;  %p856_p4 = pnand %p855_p3, %p849_p0 }
  0x26   :  { %138 = vperm.xlu0 %828, %v64_v26   ;;  %788 = vmatprep.mubr.bf16.mxu1 %v840_v45 }
  0x29   :  { %143 = vperm.xlu1 %829, %v65_v27  }
  0x2a   :  { %378 = vperm.xlu0 %828, %v360_v28  }
  0x2d   :  { %383 = vperm.xlu1 %829, %v361_v29  }
  0x2e   :  { %388 = vperm.xlu0 %828, %v362_v30  }
  0x31   :  { %393 = vperm.xlu1 %829, %v363_v31  }
  0x32   :  { %398 = vperm.xlu0 %828, %v364_v32  }
  0x35   :  { %403 = vperm.xlu1 %829, %v365_v33  }
  0x36   :  { %408 = vperm.xlu0 %828, %v366_v34  }
  0x39   :  { %413 = vperm.xlu1 %829, %v367_v35  }
  0x3a   :  { %418 = vperm.xlu0 %828, %v368_v36  }
  0x3d   :  { %423 = vperm.xlu1 %829, %v369_v37  }
  0x3e   :  { %428 = vperm.xlu0 %828, %v370_v38  }
  0x41   :  { %433 = vperm.xlu1 %829, %v371_v39  }
  0x42   :  { %438 = vperm.xlu0 %828, %v372_v40  }
  0x45   :  { %443 = vperm.xlu1 %829, %v373_v41  }
  0x46   :  { %448 = vperm.xlu0 %828, %v374_v42  }
  0x49   :  { %453 = vperm.xlu1 %829, %v375_v43  }
  0x4a   :  { %629 = vperm.xlu0 %828, %v626_v44  }
  0x86   :  { %v69_v46 = vpop.permute.xlu0 %68  ;;  %v79_v47 = vpop.permute.xlu1 %78 }
  0x8a   :  { %v74_v48 = vpop.permute.xlu0 %73  ;;  %v84_v49 = vpop.permute.xlu1 %83 }
  0x8e   :  { %v89_v50 = vpop.permute.xlu0 %88  ;;  %v94_v51 = vpop.permute.xlu1 %93 }
  0x92   :  { %v99_v52 = vpop.permute.xlu0 %98  ;;  %v104_v56 = vpop.permute.xlu1 %103 }
  0x96   :  { %v109_v0 = vpop.permute.xlu0 %108 }
  0x9c   :  { %v114_v4 = vpop.permute.xlu1 %113 }
  0x9d   :  { %v119_v13 = vpop.permute.xlu0 %118 }
  0xa0   :  { %v124_v17 = vpop.permute.xlu1 %123 }
  0xa1   :  { %v129_v25 = vpop.permute.xlu0 %128 }
  0xa4   :  { %v134_v30 = vpop.permute.xlu1 %133 }
  0xa5   :  { %v139_v37 = vpop.permute.xlu0 %138 }
  0xa8   :  { %v144_v42 = vpop.permute.xlu1 %143 }
  0xdf   :  { %v758_v53 = vpop.f32.mrb[0].mxu0 }
  0xe0   :  { %v266_v54 = vadd.f32 %v758_v53, %v79_v47  ;;  %v257_v55 = vpop.f32.mrb[1].mxu0 }
  0xe1   :  { %v258_v57 = vadd.f32 %v257_v55, %v69_v46  ;;  %v759_v58 = vpop.f32.mrb[2].mxu0  ;;  %v842_v55 = vld [vmem:[%s1104_s3 + $0x10] sm:$0xff]  }
  0xe2   :  { %v269_v59 = vadd.f32 %v759_v58, %v84_v49  ;;  %v260_v60 = vpop.f32.mrb[3].mxu0  ;;  %v322_v62 = vmax.f32 %v266_v54, 0.0  ;;  %v841_v54 = vld [vmem:[%s1104_s3 + $0x8] sm:$0xff]  }
  0xe3   :  { %v261_v61 = vadd.f32 %v260_v60, %v74_v48  ;;  %v320_v1 = vmax.f32 %v258_v57, 0.0  ;;  %v844_v57 = vld [vmem:[%s1104_s3 + $0x20] sm:$0xff]   ;;  %v845_v58 = vld [vmem:[%s1104_s3 + $0x28] sm:$0xff]   ;;  %v847_v60 = vld [vmem:[%s1104_s3 + $0x38] sm:$0xff]  }
  0xe4   :  { %v323_v63 = vmax.f32 %v269_v59, 0.0  ;;  %v846_v59 = vld [vmem:[%s1104_s3 + $0x30] sm:$0xff]  }
  0xe5   :  { %v321_v2 = vmax.f32 %v261_v61, 0.0  ;;  %v873_v61 = vmov 0.0  }
  0xe6   :  { %v353_v3 = vpack.c.bf16 %v323_v63, %v322_v62  ;;  %804 = vmatprep.subr.bf16.mxu0 %v873_v61  ;;  %820 = vmatprep.mubr.msk.bf16.mxu0 %vm874_vm1, %v873_v61  ;;  %v379_v62 = vpop.permute.xlu0 %378  ;;  %v384_v63 = vpop.permute.xlu1 %383 }
  0xe7   :  { %v762_v5 = vpop.f32.mrb[4].mxu0  ;;  %v352_v6 = vpack.c.bf16 %v321_v2, %v320_v1 }
  0xe8   :  { %v282_v7 = vadd.f32 %v762_v5, %v99_v52  ;;  %v273_v8 = vpop.f32.mrb[5].mxu0 }
  0xe9   :  { %v274_v9 = vadd.f32 %v273_v8, %v89_v50  ;;  %v763_v10 = vpop.f32.mrb[6].mxu0  ;;  %772 = vmatprep.subr.bf16.mxu1 %v352_v6 }
  0xea   :  { %v285_v11 = vadd.f32 %v763_v10, %v104_v56  ;;  %v276_v12 = vpop.f32.mrb[7].mxu0  ;;  %773 = vmatpush3.bf16.msra.mxu1 %v352_v6  ;;  %v326_v15 = vmax.f32 %v282_v7, 0.0  ;;  %v843_v56 = vld [vmem:[%s1104_s3 + $0x18] sm:$0xff]   ;;  %v394_v1 = vpop.permute.xlu1 %393 }
  0xeb   :  { %v277_v14 = vadd.f32 %v276_v12, %v94_v51  ;;  %774 = vmatprep.subr.bf16.mxu1 %v353_v3  ;;  %v324_v18 = vmax.f32 %v274_v9, 0.0 }
  0xec   :  { %v327_v16 = vmax.f32 %v285_v11, 0.0 }
  0xed   :  { %v325_v19 = vmax.f32 %v277_v14, 0.0 }
  0xee   :  { %v355_v20 = vpack.c.bf16 %v327_v16, %v326_v15  ;;  %775 = vmatpush3.bf16.msra.mxu1 %v353_v3  ;;  %v404_v3 = vpop.permute.xlu1 %403 }
  0xef   :  { %v354_v21 = vpack.c.bf16 %v325_v19, %v324_v18  ;;  %v766_v22 = vpop.f32.mrb[8].mxu0 }
  0xf0   :  { %v298_v23 = vadd.f32 %v766_v22, %v119_v13  ;;  %v289_v24 = vpop.f32.mrb[9].mxu0 }
  0xf1   :  { %v290_v26 = vadd.f32 %v289_v24, %v109_v0  ;;  %v767_v27 = vpop.f32.mrb[10].mxu0  ;;  %776 = vmatprep.subr.bf16.mxu1 %v354_v21  ;;  %v389_v0 = vpop.permute.xlu0 %388 }
  0xf2   :  { %v301_v28 = vadd.f32 %v767_v27, %v124_v17  ;;  %v292_v29 = vpop.f32.mrb[11].mxu0  ;;  %777 = vmatpush3.bf16.msra.mxu1 %v354_v21  ;;  %v330_v32 = vmax.f32 %v298_v23, 0.0  ;;  %v414_v8 = vpop.permute.xlu1 %413 }
  0xf3   :  { %v293_v31 = vadd.f32 %v292_v29, %v114_v4  ;;  %778 = vmatprep.subr.bf16.mxu1 %v355_v20  ;;  %v328_v34 = vmax.f32 %v290_v26, 0.0 }
  0xf4   :  { %v331_v33 = vmax.f32 %v301_v28, 0.0 }
  0xf5   :  { %v329_v35 = vmax.f32 %v293_v31, 0.0  ;;  %v399_v2 = vpop.permute.xlu0 %398 }
  0xf6   :  { %v357_v36 = vpack.c.bf16 %v331_v33, %v330_v32  ;;  %779 = vmatpush3.bf16.msra.mxu1 %v355_v20  ;;  %v424_v20 = vpop.permute.xlu1 %423 }
  0xf7   :  { %v356_v38 = vpack.c.bf16 %v329_v35, %v328_v34  ;;  %v770_v39 = vpop.f32.mrb[12].mxu0 }
  0xf8   :  { %v314_v40 = vadd.f32 %v770_v39, %v139_v37  ;;  %v305_v41 = vpop.f32.mrb[13].mxu0 }
  0xf9   :  { %v306_v43 = vadd.f32 %v305_v41, %v129_v25  ;;  %v771_v44 = vpop.f32.mrb[14].mxu0  ;;  %780 = vmatprep.subr.bf16.mxu1 %v356_v38  ;;  %v409_v4 = vpop.permute.xlu0 %408 }
  0xfa   :  { %v317_v45 = vadd.f32 %v771_v44, %v144_v42  ;;  %v308_v46 = vpop.f32.mrb[15].mxu0  ;;  %781 = vmatpush3.bf16.msra.mxu1 %v356_v38  ;;  %v334_v48 = vmax.f32 %v314_v40, 0.0  ;;  %v434_v33 = vpop.permute.xlu1 %433 }
  0xfb   :  { %v309_v47 = vadd.f32 %v308_v46, %v134_v30  ;;  %782 = vmatprep.subr.bf16.mxu1 %v357_v36  ;;  %v332_v50 = vmax.f32 %v306_v43, 0.0 }
  0xfc   :  { %v335_v49 = vmax.f32 %v317_v45, 0.0 }
  0xfd   :  { %v333_v51 = vmax.f32 %v309_v47, 0.0  ;;  %v419_v16 = vpop.permute.xlu0 %418 }
  0xfe   :  { %v359_v52 = vpack.c.bf16 %v335_v49, %v334_v48  ;;  %783 = vmatpush3.bf16.msra.mxu1 %v357_v36  ;;  %v444_v46 = vpop.permute.xlu1 %443 }
  0xff   :  { %v358_v53 = vpack.c.bf16 %v333_v51, %v332_v50 }
 0x101   :  { %784 = vmatprep.subr.bf16.mxu1 %v358_v53  ;;  %v429_v29 = vpop.permute.xlu0 %428 }
 0x102   :  { %785 = vmatpush3.bf16.msra.mxu1 %v358_v53 }
 0x103   :  { %786 = vmatprep.subr.bf16.mxu1 %v359_v52 }
 0x105   :  { %v439_v41 = vpop.permute.xlu0 %438 }
 0x106   :  { %787 = vmatpush3.bf16.msra.mxu1 %v359_v52 }
 0x109   :  { %789 = vmatmul.mubr.bf16.vlgmr.msra.gmra.mrb[0].mxu1 %v841_v54  ;;  %v449_v53 = vpop.permute.xlu0 %448 }
 0x10a   :  { %792 = vmatprep.mubr.bf16.mxu1 %v842_v55 }
 0x111   :  { %793 = vmatmul.mubr.bf16.gmra.mrb[4].mxu1 %v843_v56 }
 0x112   :  { %796 = vmatprep.mubr.bf16.mxu1 %v844_v57 }
 0x119   :  { %797 = vmatmul.mubr.bf16.gmra.mrb[8].mxu1 %v845_v58  ;;  %v454_v58 = vpop.permute.xlu1 %453 }
 0x11a   :  { %800 = vmatprep.mubr.bf16.mxu1 %v846_v59 }
 0x121   :  { %801 = vmatmul.mubr.bf16.gmra.mrb[12].mxu1 %v847_v60 }
 0x1dc   :  { %v790_v5 = vpop.f32.mrb[0].mxu1 }
 0x1dd   :  { %v547_v6 = vadd.f32 %v790_v5, %v389_v0  ;;  %v538_v7 = vpop.f32.mrb[1].mxu1 }
 0x1de   :  { %v539_v9 = vadd.f32 %v538_v7, %v379_v62  ;;  %v791_v10 = vpop.f32.mrb[2].mxu1  ;;  %v617_v7 = vld [vmem:[%s1106_s5] sm:$0x1] }
 0x1df   :  { %v550_v11 = vadd.f32 %v791_v10, %v394_v1  ;;  %v541_v12 = vpop.f32.mrb[3].mxu1  ;;  %v603_v14 = vmax.f32 %v547_v6, 0.0 }
 0x1e0   :  { %v542_v13 = vadd.f32 %v541_v12, %v384_v63  ;;  %v601_v17 = vmax.f32 %v539_v9, 0.0 }
 0x1e1   :  { %v604_v15 = vmax.f32 %v550_v11, 0.0  ;;  %v630_v11 = vpop.permute.xlu0 %629 }
 0x1e2   :  { %v602_v18 = vmax.f32 %v542_v13, 0.0 }
 0x1e3   :  { %v619_v19 = vpack.c.bf16 %v604_v15, %v603_v14 }
 0x1e4   :  { %v618_v21 = vpack.c.bf16 %v602_v18, %v601_v17  ;;  %v794_v22 = vpop.f32.mrb[4].mxu1 }
 0x1e5   :  { %v563_v23 = vadd.f32 %v794_v22, %v409_v4  ;;  %v554_v24 = vpop.f32.mrb[5].mxu1 }
 0x1e6   :  { %v555_v25 = vadd.f32 %v554_v24, %v399_v2  ;;  %v795_v26 = vpop.f32.mrb[6].mxu1  ;;  %805 = vmatpush3.bf16.msra.mxu0 %v618_v21 }
 0x1e7   :  { %v566_v27 = vadd.f32 %v795_v26, %v414_v8  ;;  %v557_v28 = vpop.f32.mrb[7].mxu1  ;;  %806 = vmatprep.subr.bf16.mxu0 %v873_v61  ;;  %v607_v31 = vmax.f32 %v563_v23, 0.0  ;;  %v632_v8 = vlaneseq }
 0x1e8   :  { %v558_v30 = vadd.f32 %v557_v28, %v404_v3  ;;  %v605_v34 = vmax.f32 %v555_v25, 0.0 }
 0x1e9   :  { %v608_v32 = vmax.f32 %v566_v27, 0.0  ;;  %v633_v9 = vshrl.u32 %v632_v8, 7 }
 0x1ea   :  { %v606_v35 = vmax.f32 %v558_v30, 0.0  ;;  %807 = vmatpush3.bf16.msra.mxu0 %v619_v19 }
 0x1eb   :  { %v621_v36 = vpack.c.bf16 %v608_v32, %v607_v31  ;;  %808 = vmatprep.subr.bf16.mxu0 %v873_v61  ;;  %v634_v10 = vsub.s32 0, %v633_v9 }
 0x1ec   :  { %v620_v37 = vpack.c.bf16 %v606_v35, %v605_v34  ;;  %v798_v38 = vpop.f32.mrb[8].mxu1 }
 0x1ed   :  { %v579_v39 = vadd.f32 %v798_v38, %v429_v29  ;;  %v570_v40 = vpop.f32.mrb[9].mxu1  ;;  %v635_v12 = vrot.slane %v630_v11, %v634_v10 }
 0x1ee   :  { %v571_v42 = vadd.f32 %v570_v40, %v419_v16  ;;  %v799_v43 = vpop.f32.mrb[10].mxu1  ;;  %809 = vmatpush3.bf16.msra.mxu0 %v620_v37 }
 0x1ef   :  { %v582_v44 = vadd.f32 %v799_v43, %v434_v33  ;;  %v573_v45 = vpop.f32.mrb[11].mxu1  ;;  %810 = vmatprep.subr.bf16.mxu0 %v873_v61  ;;  %v611_v48 = vmax.f32 %v579_v39, 0.0 }
 0x1f0   :  { %v574_v47 = vadd.f32 %v573_v45, %v424_v20  ;;  %v609_v50 = vmax.f32 %v571_v42, 0.0 }
 0x1f1   :  { %v612_v49 = vmax.f32 %v582_v44, 0.0 }
 0x1f2   :  { %v610_v51 = vmax.f32 %v574_v47, 0.0  ;;  %811 = vmatpush3.bf16.msra.mxu0 %v621_v36 }
 0x1f3   :  { %v623_v52 = vpack.c.bf16 %v612_v49, %v611_v48  ;;  %812 = vmatprep.subr.bf16.mxu0 %v873_v61 }
 0x1f4   :  { %v622_v54 = vpack.c.bf16 %v610_v51, %v609_v50  ;;  %v802_v55 = vpop.f32.mrb[12].mxu1 }
 0x1f5   :  { %v595_v56 = vadd.f32 %v802_v55, %v449_v53  ;;  %v586_v57 = vpop.f32.mrb[13].mxu1 }
 0x1f6   :  { %v587_v59 = vadd.f32 %v586_v57, %v439_v41  ;;  %v803_v60 = vpop.f32.mrb[14].mxu1  ;;  %813 = vmatpush3.bf16.msra.mxu0 %v622_v54 }
 0x1f7   :  { %v598_v62 = vadd.f32 %v803_v60, %v454_v58  ;;  %v589_v63 = vpop.f32.mrb[15].mxu1  ;;  %814 = vmatprep.subr.bf16.mxu0 %v873_v61  ;;  %v615_v1 = vmax.f32 %v595_v56, 0.0 }
 0x1f8   :  { %v590_v0 = vadd.f32 %v589_v63, %v444_v46  ;;  %v613_v3 = vmax.f32 %v587_v59, 0.0 }
 0x1f9   :  { %v616_v2 = vmax.f32 %v598_v62, 0.0 }
 0x1fa   :  { %v614_v4 = vmax.f32 %v590_v0, 0.0  ;;  %815 = vmatpush3.bf16.msra.mxu0 %v623_v52 }
 0x1fb   :  { %v625_v5 = vpack.c.bf16 %v616_v2, %v615_v1  ;;  %816 = vmatprep.subr.bf16.mxu0 %v873_v61 }
 0x1fc   :  { %v624_v6 = vpack.c.bf16 %v614_v4, %v613_v3 }
 0x1fe   :  { %817 = vmatpush3.bf16.msra.mxu0 %v624_v6 }
 0x1ff   :  { %818 = vmatprep.subr.bf16.mxu0 %v873_v61 }
 0x202   :  { %819 = vmatpush3.bf16.msra.mxu0 %v625_v5 }
 0x205   :  { %821 = vmatmul.mubr.bf16.vlgmr.msra.gmra.mrb[16].mxu0 %v617_v7 }
 0x2d8   :  { %v670_v13 = vpop.f32.mrb[16].mxu0 }
 0x2d9   :  { %v671_v14 = vadd.f32 %v670_v13, %v635_v12  ;;  %v822_v15 = vpop.f32.mrb[17].mxu0 }
 0x2da   :  { %v673_v16 = vpop.f32.mrb[18].mxu0 }
 0x2db   :  { %676 = vst [vmem:[#allocation3] sm:$0x1] %v671_v14  ;;  %v823_v61 = vpop.f32.mrb[19].mxu0 }
 0x2dc   :  { %859 = shalt.err (!%p856_p4)
}
 0x2dd   :  { %s860_s27 = scalar_lea.hbm %s1108_s7, 16 }
 0x2de   :  { %p861_p5 = scmp.ne.s32.totalorder %s1108_s7, %s860_s27  ;;  %p864_p6 = scmp.lt.u32.totalorder %s860_s27, %s1108_s7 }
 0x2e0   :  { %p866_p7 = pnand %p864_p6, %p861_p5 }
 0x2e2   :  { %869 = shalt.err (!%p866_p7)
}
 0x2e3   :  { %686 = dma.vmem_to_hbm [thread:$0]  %s684_s23, 16, %s1108_s7, [#allocation4]  }
 0x2e4   :  { %870 = dma.done.wait [#allocation4], 16  }
 0x2e5   :  { %871 = vsyncadd [#allocation4], 4294967280 }
 0x2e6   :  { %690 = vsyncpa [#allocation4], 1 }

</bundles_post_ra>
